<compile_context>
chip_gen: v7x
topology: tpu7x:2x2x1
jax: 0.10.0
libtpu: 0.0.40
codegen_flags: <defaults>
</compile_context>

<pallas_src>
import functools
import math

import jax
import jax.numpy as jnp
from jax.experimental import pallas as pl
from jax.experimental.pallas import tpu as pltpu

LOG_STD_MAX = 2.0
LOG_STD_MIN = -20.0
_LOG_2PI = math.log(2.0 * math.pi)
_LOG_2 = math.log(2.0)
_OUT_W = 128          # lane-dense output width: lanes [0, A) action, lane A = logp


def _round_up(n, m):
    return ((n + m - 1) // m) * m


def gmm_head_kernel(x_ref, w_ref, b_ref, out_ref, *, num_components, act_dim,
                    seg, logits_off, act_limit):
    K, A = num_components, act_dim
    KA = K * A
    TB = x_ref.shape[0]
    f32 = jnp.float32

    # ---- single fused matmul: y = x @ [Wmu | Wls,logits] + b (bf16 MXU, f32 acc)
    xb = x_ref[...].astype(w_ref.dtype)                     # in-kernel cast (VPU)
    y = jnp.dot(xb, w_ref[...], preferred_element_type=f32) + b_ref[...]  # (TB, P)

    mu = y[:, 0:KA]                                                  # (TB, K*A)
    ls = jnp.clip(y[:, seg:seg + KA], LOG_STD_MIN, LOG_STD_MAX)      # (TB, K*A)
    logits = y[:, logits_off:logits_off + K]                         # (TB, K)

    # ---- mixture log-softmax, reusing the logsumexp exponentials -------------
    mmax = jnp.max(logits, axis=-1, keepdims=True)
    e = jnp.exp(logits - mmax)                                       # (TB, K)
    s = jnp.sum(e, axis=-1, keepdims=True)
    log_mix = (logits - mmax) - jnp.log(s)                           # (TB, K)
    mix_p = e / s                                                    # (TB, K)

    inv_std = jnp.exp(-ls)                                           # (TB, K*A)

    # ---- GMM mean (deterministic pre-squash action): a = sum_k w_k * mu_k ----
    # K is tiny and static -> unrolled pure-VPU lane-slice work (no MXU, so no
    # default-precision bf16 rounding of f32 operands).
    a = jnp.zeros((TB, A), f32)
    for k in range(K):
        a = a + mix_p[:, k:k + 1] * mu[:, k * A:(k + 1) * A]

    # ---- gmm.log_prob(a): per-component Independent-Normal logpdf, then a
    # ---- stacked logsumexp over the K components ------------------------------
    comp_cols = []
    for k in range(K):
        mu_k = mu[:, k * A:(k + 1) * A]
        ls_k = ls[:, k * A:(k + 1) * A]
        z = (a - mu_k) * inv_std[:, k * A:(k + 1) * A]
        comp_cols.append(jnp.sum(-0.5 * z * z - ls_k, axis=-1, keepdims=True))
    comp_lp = jnp.concatenate(comp_cols, axis=-1) - 0.5 * A * _LOG_2PI  # (TB, K)

    stacked = log_mix + comp_lp                                      # (TB, K)
    smax = jnp.max(stacked, axis=-1, keepdims=True)
    gmm_lp = smax + jnp.log(jnp.sum(jnp.exp(stacked - smax),
                                    axis=-1, keepdims=True))         # (TB, 1)

    # ---- tanh-squash correction ------------------------------------------------
    t = -2.0 * a
    softplus_t = jnp.maximum(t, 0.0) + jnp.log1p(jnp.exp(-jnp.abs(t)))
    corr = jnp.sum(2.0 * (_LOG_2 - a - softplus_t),
                   axis=-1, keepdims=True)                           # (TB, 1)
    logp = gmm_lp - corr                                             # (TB, 1)
    act = act_limit * jnp.tanh(a)                                    # (TB, A)

    # ---- single lane-dense store ------------------------------------------------
    pad = out_ref.shape[1] - A - 1
    out_ref[...] = jnp.concatenate(
        [act, logp, jnp.zeros((TB, pad), f32)], axis=-1)


def prepare_gmm_head_params(params, *, num_components, act_dim, latent_dim,
                            matmul_dtype=jnp.bfloat16):
    """Fuse the three nn.Linear weights into one lane-padded (L, P) slab.

    Layout: mu -> lanes [0, K*A); log_std -> [seg, seg+K*A); logits packed in
    the tail of the log_std segment when they fit (P = 2*seg), otherwise in a
    third 128-padded segment.  Call ONCE at parameter-load time and reuse;
    PyTorch nn.Linear weights are (out, in), so they are transposed here.
    """
    K, A, L = num_components, act_dim, latent_dim
    KA = K * A
    seg = _round_up(KA, 128)
    if seg - KA >= K:
        logits_off = seg + KA          # tail of the log_std segment
        P = 2 * seg
    else:
        logits_off = 2 * seg
        P = 2 * seg + _round_up(K, 128)

    W = jnp.zeros((L, P), jnp.float32)
    W = W.at[:, 0:KA].set(jnp.asarray(params["wmu"], jnp.float32).T)
    W = W.at[:, seg:seg + KA].set(jnp.asarray(params["wls"], jnp.float32).T)
    W = W.at[:, logits_off:logits_off + K].set(
        jnp.asarray(params["wlg"], jnp.float32).T)

    b = jnp.zeros((1, P), jnp.float32)
    b = b.at[0, 0:KA].set(jnp.asarray(params["bmu"], jnp.float32))
    b = b.at[0, seg:seg + KA].set(jnp.asarray(params["bls"], jnp.float32))
    b = b.at[0, logits_off:logits_off + K].set(jnp.asarray(params["blg"], jnp.float32))

    return {"W": W.astype(matmul_dtype), "b": b, "seg": seg,
            "logits_off": logits_off}


def gmm_policy_head_forward(x, fused, *, num_components, act_dim, act_limit,
                            block_b=1024):
    """x: (batch, latent_dim) f32. Returns (pi_action (B, A) f32, logp_pi (B,) f32)."""
    B, L = x.shape
    K, A = num_components, act_dim
    W, b = fused["W"], fused["b"]
    seg, logits_off = fused["seg"], fused["logits_off"]
    P = W.shape[1]
    assert A + 1 <= _OUT_W, "action dim + logp lane must fit in one 128-lane block"

    # Batch tile: big (amortize ~0.35us/grid-step), multiple of 8, and when the
    # batch allows it guarantee >= 2 grid steps so the "parallel" axis can be
    # sharded across both TensorCores on v7x.  VMEM at TB=1024 stays far under
    # the 32 MiB default scoped limit on v5e/v6e/v7x.
    B8 = _round_up(B, 8)
    TB = min(_round_up(block_b, 8), B8)
    if TB >= B8 and B8 >= 16:
        TB = max(8, (B8 // 2) // 8 * 8)
    B_pad = _round_up(B, TB)

    # No wrapper-side dtype cast; pad only if required.
    x_p = x if B_pad == B else jnp.pad(x, ((0, B_pad - B), (0, 0)))

    kernel = functools.partial(
        gmm_head_kernel, num_components=K, act_dim=A, seg=seg,
        logits_off=logits_off, act_limit=float(act_limit))

    cost = pl.CostEstimate(
        flops=2 * B_pad * L * P,
        transcendentals=B_pad * (K * A + 3 * K + 3 * A),
        bytes_accessed=(B_pad * L * x.dtype.itemsize
                        + W.size * W.dtype.itemsize
                        + b.size * 4
                        + B_pad * _OUT_W * 4))

    out = pl.pallas_call(
        kernel,
        out_shape=jax.ShapeDtypeStruct((B_pad, _OUT_W), jnp.float32),
        grid=(B_pad // TB,),
        in_specs=[
            pl.BlockSpec((TB, L), lambda i: (i, 0)),     # x tile (pipelined)
            pl.BlockSpec((L, P), lambda i: (0, 0)),      # fused weights (resident)
            pl.BlockSpec((1, P), lambda i: (0, 0)),      # fused bias (resident)
        ],
        out_specs=pl.BlockSpec((TB, _OUT_W), lambda i: (i, 0)),
        compiler_params=pltpu.CompilerParams(
            dimension_semantics=("parallel",)),          # dual-TC sharding on v7x
        cost_estimate=cost,
    )(x_p, W, b)

    pi_action = out[:B, :A]
    logp_pi = out[:B, A]
    return pi_action, logp_pi


def _reference_forward(x, params, *, num_components, act_dim, act_limit,
                       matmul_dtype=jnp.float32):
    """Pure-JAX reference mirroring the PyTorch deterministic forward.

    `matmul_dtype` lets us precision-match the kernel's bf16 MXU operands
    (operands rounded to bf16, accumulation and epilogue in f32).
    """
    K, A = num_components, act_dim
    xd = x.astype(matmul_dtype).astype(jnp.float32)
    wmu = params["wmu"].astype(matmul_dtype).astype(jnp.float32)
    wls = params["wls"].astype(matmul_dtype).astype(jnp.float32)
    wlg = params["wlg"].astype(matmul_dtype).astype(jnp.float32)

    mu = (xd @ wmu.T + params["bmu"]).reshape(-1, K, A)
    log_std = (xd @ wls.T + params["bls"]).reshape(-1, K, A)
    log_std = jnp.clip(log_std, LOG_STD_MIN, LOG_STD_MAX)
    std = jnp.exp(log_std)
    logits = xd @ wlg.T + params["blg"]
    log_mix = jax.nn.log_softmax(logits, axis=-1)
    probs = jnp.exp(log_mix)
    a = jnp.sum(probs[:, :, None] * mu, axis=1)                       # gmm.mean
    comp_lp = jnp.sum(-0.5 * ((a[:, None, :] - mu) / std) ** 2
                      - log_std - 0.5 * _LOG_2PI, axis=-1)            # (B, K)
    gmm_lp = jax.scipy.special.logsumexp(log_mix + comp_lp, axis=-1)  # (B,)
    corr = jnp.sum(2.0 * (_LOG_2 - a - jax.nn.softplus(-2.0 * a)), axis=-1)
    return act_limit * jnp.tanh(a), gmm_lp - corr


if __name__ == "__main__":
    B, L, A, K = 4, 32, 8, 4
    ACT_LIMIT = 1.5

    key = jax.random.PRNGKey(0)
    ks = jax.random.split(key, 7)
    params = {
        "wmu": 0.1 * jax.random.normal(ks[0], (A * K, L), jnp.float32),
        "bmu": 0.1 * jax.random.normal(ks[1], (A * K,), jnp.float32),
        "wls": 0.1 * jax.random.normal(ks[2], (A * K, L), jnp.float32),
        "bls": 0.1 * jax.random.normal(ks[3], (A * K,), jnp.float32),
        "wlg": 0.1 * jax.random.normal(ks[4], (K, L), jnp.float32),
        "blg": 0.1 * jax.random.normal(ks[5], (K,), jnp.float32),
    }
    x = jax.random.normal(ks[6], (B, L), jnp.float32)

    fused = prepare_gmm_head_params(params, num_components=K, act_dim=A,
                                    latent_dim=L, matmul_dtype=jnp.bfloat16)

    act, logp = gmm_policy_head_forward(
        x, fused, num_components=K, act_dim=A, act_limit=ACT_LIMIT)
    jax.block_until_ready((act, logp))

    # Tight check against a precision-matched reference (bf16 matmul operands,
    # f32 accumulation/epilogue — same arithmetic as the kernel).
    act_ref, logp_ref = _reference_forward(
        x, params, num_components=K, act_dim=A, act_limit=ACT_LIMIT,
        matmul_dtype=jnp.bfloat16)
    assert jnp.allclose(act, act_ref, atol=1e-3, rtol=1e-3), "act mismatch"
    assert jnp.allclose(logp, logp_ref, atol=1e-3, rtol=1e-3), "logp mismatch"

    # Loose sanity check against the full-f32 module semantics (differences
    # come only from bf16 quantization of the MXU operands).
    act_f32, logp_f32 = _reference_forward(
        x, params, num_components=K, act_dim=A, act_limit=ACT_LIMIT,
        matmul_dtype=jnp.float32)
    assert jnp.allclose(act, act_f32, atol=1e-1, rtol=1e-1), "act drift vs f32"
    assert jnp.allclose(logp, logp_f32, atol=1e-1, rtol=1e-1), "logp drift vs f32"

    print("KERNEL_OK")
</pallas_src>

<mosaic_0001>
module attributes {stable_mosaic.version = 11 : i64} {
  func.func @gmm_head_kernel(%arg0: i32, %arg1: memref<8x32xf32, #tpu.memory_space<vmem>>, %arg2: memref<32x256xbf16, #tpu.memory_space<vmem>>, %arg3: memref<1x256xf32, #tpu.memory_space<vmem>>, %arg4: memref<8x128xf32, #tpu.memory_space<vmem>>) attributes {dimension_semantics = [#tpu.dimension_semantics<parallel>], iteration_bounds = array<i64: 1>, scalar_prefetch = 0 : i64, scratch_operands = 0 : i64, tpu.core_type = #tpu.core_type<tc>, window_params = [{transform_indices = @transform_0, window_bounds = array<i64: 8, 32>}, {pipeline_mode = #tpu.pipeline_mode<synchronous>, transform_indices = @transform_1, window_bounds = array<i64: 32, 256>}, {pipeline_mode = #tpu.pipeline_mode<synchronous>, transform_indices = @transform_2, window_bounds = array<i64: 1, 256>}, {transform_indices = @transform_3, window_bounds = array<i64: 8, 128>}]} {
    %c0 = arith.constant 0 : index
    %c0_0 = arith.constant 0 : index
    %0 = vector.load %arg1[%c0, %c0_0] : memref<8x32xf32, #tpu.memory_space<vmem>>, vector<8x32xf32>
    %1 = arith.truncf %0 : vector<8x32xf32> to vector<8x32xbf16>
    %c0_1 = arith.constant 0 : index
    %c0_2 = arith.constant 0 : index
    %2 = vector.load %arg2[%c0_1, %c0_2] : memref<32x256xbf16, #tpu.memory_space<vmem>>, vector<32x256xbf16>
    %cst = arith.constant dense<0.000000e+00> : vector<8x256xf32>
    %3 = tpu.matmul %1, %2, %cst {dimension_numbers = #tpu.dot_dimension_numbers<[1], [0], [0], [1], [0, 0, 1, 1], [], []>} : vector<8x32xbf16>, vector<32x256xbf16>, vector<8x256xf32> -> vector<8x256xf32>
    %c0_3 = arith.constant 0 : index
    %c0_4 = arith.constant 0 : index
    %4 = vector.load %arg3[%c0_3, %c0_4] : memref<1x256xf32, #tpu.memory_space<vmem>>, vector<1x256xf32>
    %5 = vector.broadcast %4 : vector<1x256xf32> to vector<8x256xf32>
    %6 = arith.addf %3, %5 : vector<8x256xf32>
    %7 = vector.extract_strided_slice %6 {offsets = [0, 0], sizes = [8, 32], strides = [1, 1]} : vector<8x256xf32> to vector<8x32xf32>
    %8 = vector.extract_strided_slice %6 {offsets = [0, 128], sizes = [8, 32], strides = [1, 1]} : vector<8x256xf32> to vector<8x32xf32>
    %cst_5 = arith.constant -2.000000e+01 : f32
    %cst_6 = arith.constant 2.000000e+00 : f32
    %9 = vector.broadcast %cst_5 : f32 to vector<8x32xf32>
    %10 = arith.maximumf %9, %8 : vector<8x32xf32>
    %11 = vector.broadcast %cst_6 : f32 to vector<8x32xf32>
    %12 = arith.minimumf %11, %10 : vector<8x32xf32>
    %13 = vector.extract_strided_slice %6 {offsets = [0, 160], sizes = [8, 4], strides = [1, 1]} : vector<8x256xf32> to vector<8x4xf32>
    %cst_7 = arith.constant dense<0xFF800000> : vector<8xf32>
    %14 = vector.multi_reduction <maximumf>, %13, %cst_7 [1] : vector<8x4xf32> to vector<8xf32>
    %15 = vector.shape_cast %14 : vector<8xf32> to vector<8x1xf32>
    %16 = vector.broadcast %15 : vector<8x1xf32> to vector<8x4xf32>
    %17 = arith.subf %13, %16 : vector<8x4xf32>
    %18 = math.exp %17 : vector<8x4xf32>
    %cst_8 = arith.constant dense<0.000000e+00> : vector<8xf32>
    %19 = vector.multi_reduction <add>, %18, %cst_8 [1] : vector<8x4xf32> to vector<8xf32>
    %20 = vector.shape_cast %19 : vector<8xf32> to vector<8x1xf32>
    %21 = vector.broadcast %15 : vector<8x1xf32> to vector<8x4xf32>
    %22 = arith.subf %13, %21 : vector<8x4xf32>
    %23 = math.log %20 : vector<8x1xf32>
    %24 = vector.broadcast %23 : vector<8x1xf32> to vector<8x4xf32>
    %25 = arith.subf %22, %24 : vector<8x4xf32>
    %26 = vector.broadcast %20 : vector<8x1xf32> to vector<8x4xf32>
    %27 = arith.divf %18, %26 : vector<8x4xf32>
    %cst_9 = arith.constant 0.000000e+00 : f32
    %28 = vector.broadcast %cst_9 : f32 to vector<8x32xf32>
    %29 = arith.subf %28, %12 : vector<8x32xf32>
    %30 = math.exp %29 : vector<8x32xf32>
    %cst_10 = arith.constant 0.000000e+00 : f32
    %31 = vector.broadcast %cst_10 : f32 to vector<8x8xf32>
    %32 = vector.extract_strided_slice %27 {offsets = [0, 0], sizes = [8, 1], strides = [1, 1]} : vector<8x4xf32> to vector<8x1xf32>
    %33 = vector.extract_strided_slice %7 {offsets = [0, 0], sizes = [8, 8], strides = [1, 1]} : vector<8x32xf32> to vector<8x8xf32>
    %34 = vector.broadcast %32 : vector<8x1xf32> to vector<8x8xf32>
    %35 = arith.mulf %34, %33 : vector<8x8xf32>
    %36 = arith.addf %31, %35 : vector<8x8xf32>
    %37 = vector.extract_strided_slice %27 {offsets = [0, 1], sizes = [8, 1], strides = [1, 1]} : vector<8x4xf32> to vector<8x1xf32>
    %38 = vector.extract_strided_slice %7 {offsets = [0, 8], sizes = [8, 8], strides = [1, 1]} : vector<8x32xf32> to vector<8x8xf32>
    %39 = vector.broadcast %37 : vector<8x1xf32> to vector<8x8xf32>
    %40 = arith.mulf %39, %38 : vector<8x8xf32>
    %41 = arith.addf %36, %40 : vector<8x8xf32>
    %42 = vector.extract_strided_slice %27 {offsets = [0, 2], sizes = [8, 1], strides = [1, 1]} : vector<8x4xf32> to vector<8x1xf32>
    %43 = vector.extract_strided_slice %7 {offsets = [0, 16], sizes = [8, 8], strides = [1, 1]} : vector<8x32xf32> to vector<8x8xf32>
    %44 = vector.broadcast %42 : vector<8x1xf32> to vector<8x8xf32>
    %45 = arith.mulf %44, %43 : vector<8x8xf32>
    %46 = arith.addf %41, %45 : vector<8x8xf32>
    %47 = vector.extract_strided_slice %27 {offsets = [0, 3], sizes = [8, 1], strides = [1, 1]} : vector<8x4xf32> to vector<8x1xf32>
    %48 = vector.extract_strided_slice %7 {offsets = [0, 24], sizes = [8, 8], strides = [1, 1]} : vector<8x32xf32> to vector<8x8xf32>
    %49 = vector.broadcast %47 : vector<8x1xf32> to vector<8x8xf32>
    %50 = arith.mulf %49, %48 : vector<8x8xf32>
    %51 = arith.addf %46, %50 : vector<8x8xf32>
    %52 = vector.extract_strided_slice %7 {offsets = [0, 0], sizes = [8, 8], strides = [1, 1]} : vector<8x32xf32> to vector<8x8xf32>
    %53 = vector.extract_strided_slice %12 {offsets = [0, 0], sizes = [8, 8], strides = [1, 1]} : vector<8x32xf32> to vector<8x8xf32>
    %54 = arith.subf %51, %52 : vector<8x8xf32>
    %55 = vector.extract_strided_slice %30 {offsets = [0, 0], sizes = [8, 8], strides = [1, 1]} : vector<8x32xf32> to vector<8x8xf32>
    %56 = arith.mulf %54, %55 : vector<8x8xf32>
    %cst_11 = arith.constant -5.000000e-01 : f32
    %57 = vector.broadcast %cst_11 : f32 to vector<8x8xf32>
    %58 = arith.mulf %57, %56 : vector<8x8xf32>
    %59 = arith.mulf %58, %56 : vector<8x8xf32>
    %60 = arith.subf %59, %53 : vector<8x8xf32>
    %cst_12 = arith.constant dense<0.000000e+00> : vector<8xf32>
    %61 = vector.multi_reduction <add>, %60, %cst_12 [1] : vector<8x8xf32> to vector<8xf32>
    %62 = vector.shape_cast %61 : vector<8xf32> to vector<8x1xf32>
    %63 = vector.extract_strided_slice %7 {offsets = [0, 8], sizes = [8, 8], strides = [1, 1]} : vector<8x32xf32> to vector<8x8xf32>
    %64 = vector.extract_strided_slice %12 {offsets = [0, 8], sizes = [8, 8], strides = [1, 1]} : vector<8x32xf32> to vector<8x8xf32>
    %65 = arith.subf %51, %63 : vector<8x8xf32>
    %66 = vector.extract_strided_slice %30 {offsets = [0, 8], sizes = [8, 8], strides = [1, 1]} : vector<8x32xf32> to vector<8x8xf32>
    %67 = arith.mulf %65, %66 : vector<8x8xf32>
    %cst_13 = arith.constant -5.000000e-01 : f32
    %68 = vector.broadcast %cst_13 : f32 to vector<8x8xf32>
    %69 = arith.mulf %68, %67 : vector<8x8xf32>
    %70 = arith.mulf %69, %67 : vector<8x8xf32>
    %71 = arith.subf %70, %64 : vector<8x8xf32>
    %cst_14 = arith.constant dense<0.000000e+00> : vector<8xf32>
    %72 = vector.multi_reduction <add>, %71, %cst_14 [1] : vector<8x8xf32> to vector<8xf32>
    %73 = vector.shape_cast %72 : vector<8xf32> to vector<8x1xf32>
    %74 = vector.extract_strided_slice %7 {offsets = [0, 16], sizes = [8, 8], strides = [1, 1]} : vector<8x32xf32> to vector<8x8xf32>
    %75 = vector.extract_strided_slice %12 {offsets = [0, 16], sizes = [8, 8], strides = [1, 1]} : vector<8x32xf32> to vector<8x8xf32>
    %76 = arith.subf %51, %74 : vector<8x8xf32>
    %77 = vector.extract_strided_slice %30 {offsets = [0, 16], sizes = [8, 8], strides = [1, 1]} : vector<8x32xf32> to vector<8x8xf32>
    %78 = arith.mulf %76, %77 : vector<8x8xf32>
    %cst_15 = arith.constant -5.000000e-01 : f32
    %79 = vector.broadcast %cst_15 : f32 to vector<8x8xf32>
    %80 = arith.mulf %79, %78 : vector<8x8xf32>
    %81 = arith.mulf %80, %78 : vector<8x8xf32>
    %82 = arith.subf %81, %75 : vector<8x8xf32>
    %cst_16 = arith.constant dense<0.000000e+00> : vector<8xf32>
    %83 = vector.multi_reduction <add>, %82, %cst_16 [1] : vector<8x8xf32> to vector<8xf32>
    %84 = vector.shape_cast %83 : vector<8xf32> to vector<8x1xf32>
    %85 = vector.extract_strided_slice %7 {offsets = [0, 24], sizes = [8, 8], strides = [1, 1]} : vector<8x32xf32> to vector<8x8xf32>
    %86 = vector.extract_strided_slice %12 {offsets = [0, 24], sizes = [8, 8], strides = [1, 1]} : vector<8x32xf32> to vector<8x8xf32>
    %87 = arith.subf %51, %85 : vector<8x8xf32>
    %88 = vector.extract_strided_slice %30 {offsets = [0, 24], sizes = [8, 8], strides = [1, 1]} : vector<8x32xf32> to vector<8x8xf32>
    %89 = arith.mulf %87, %88 : vector<8x8xf32>
    %cst_17 = arith.constant -5.000000e-01 : f32
    %90 = vector.broadcast %cst_17 : f32 to vector<8x8xf32>
    %91 = arith.mulf %90, %89 : vector<8x8xf32>
    %92 = arith.mulf %91, %89 : vector<8x8xf32>
    %93 = arith.subf %92, %86 : vector<8x8xf32>
    %cst_18 = arith.constant dense<0.000000e+00> : vector<8xf32>
    %94 = vector.multi_reduction <add>, %93, %cst_18 [1] : vector<8x8xf32> to vector<8xf32>
    %95 = vector.shape_cast %94 : vector<8xf32> to vector<8x1xf32>
    %96 = tpu.concatenate %62, %73, %84, %95 in 1 : vector<8x1xf32>, vector<8x1xf32>, vector<8x1xf32>, vector<8x1xf32> -> vector<8x4xf32>
    %cst_19 = arith.constant 7.35150814 : f32
    %97 = vector.broadcast %cst_19 : f32 to vector<8x4xf32>
    %98 = arith.subf %96, %97 : vector<8x4xf32>
    %99 = arith.addf %25, %98 : vector<8x4xf32>
    %cst_20 = arith.constant dense<0xFF800000> : vector<8xf32>
    %100 = vector.multi_reduction <maximumf>, %99, %cst_20 [1] : vector<8x4xf32> to vector<8xf32>
    %101 = vector.shape_cast %100 : vector<8xf32> to vector<8x1xf32>
    %102 = vector.broadcast %101 : vector<8x1xf32> to vector<8x4xf32>
    %103 = arith.subf %99, %102 : vector<8x4xf32>
    %104 = math.exp %103 : vector<8x4xf32>
    %cst_21 = arith.constant dense<0.000000e+00> : vector<8xf32>
    %105 = vector.multi_reduction <add>, %104, %cst_21 [1] : vector<8x4xf32> to vector<8xf32>
    %106 = vector.shape_cast %105 : vector<8xf32> to vector<8x1xf32>
    %107 = math.log %106 : vector<8x1xf32>
    %108 = arith.addf %101, %107 : vector<8x1xf32>
    %cst_22 = arith.constant -2.000000e+00 : f32
    %109 = vector.broadcast %cst_22 : f32 to vector<8x8xf32>
    %110 = arith.mulf %109, %51 : vector<8x8xf32>
    %cst_23 = arith.constant 0.000000e+00 : f32
    %111 = vector.broadcast %cst_23 : f32 to vector<8x8xf32>
    %112 = arith.maximumf %110, %111 : vector<8x8xf32>
    %113 = math.absf %110 : vector<8x8xf32>
    %cst_24 = arith.constant 0.000000e+00 : f32
    %114 = vector.broadcast %cst_24 : f32 to vector<8x8xf32>
    %115 = arith.subf %114, %113 : vector<8x8xf32>
    %116 = math.exp %115 : vector<8x8xf32>
    %117 = math.log1p %116 : vector<8x8xf32>
    %118 = arith.addf %112, %117 : vector<8x8xf32>
    %cst_25 = arith.constant 0.693147182 : f32
    %119 = vector.broadcast %cst_25 : f32 to vector<8x8xf32>
    %120 = arith.subf %119, %51 : vector<8x8xf32>
    %121 = arith.subf %120, %118 : vector<8x8xf32>
    %cst_26 = arith.constant 2.000000e+00 : f32
    %122 = vector.broadcast %cst_26 : f32 to vector<8x8xf32>
    %123 = arith.mulf %122, %121 : vector<8x8xf32>
    %cst_27 = arith.constant dense<0.000000e+00> : vector<8xf32>
    %124 = vector.multi_reduction <add>, %123, %cst_27 [1] : vector<8x8xf32> to vector<8xf32>
    %125 = vector.shape_cast %124 : vector<8xf32> to vector<8x1xf32>
    %126 = arith.subf %108, %125 : vector<8x1xf32>
    %127 = math.tanh %51 : vector<8x8xf32>
    %cst_28 = arith.constant 1.500000e+00 : f32
    %128 = vector.broadcast %cst_28 : f32 to vector<8x8xf32>
    %129 = arith.mulf %128, %127 : vector<8x8xf32>
    %cst_29 = arith.constant 0.000000e+00 : f32
    %130 = vector.broadcast %cst_29 : f32 to vector<8x119xf32>
    %131 = tpu.concatenate %129, %126, %130 in 1 : vector<8x8xf32>, vector<8x1xf32>, vector<8x119xf32> -> vector<8x128xf32>
    %c0_30 = arith.constant 0 : index
    %c0_31 = arith.constant 0 : index
    %132 = vector.load %arg4[%c0_30, %c0_31] : memref<8x128xf32, #tpu.memory_space<vmem>>, vector<8x128xf32>
    tpu.vector_store %arg4[%c0_30, %c0_31], %131 {strides = array<i32>} : memref<8x128xf32, #tpu.memory_space<vmem>>, vector<8x128xf32>,
    return
  }
  func.func @transform_0(%arg0: i32) -> (i32, i32) {
    %c0_i32 = arith.constant 0 : i32
    %c0_i32_0 = arith.constant 0 : i32
    return %arg0, %c0_i32 : i32, i32
  }
  func.func @transform_1(%arg0: i32) -> (i32, i32) {
    %c0_i32 = arith.constant 0 : i32
    %c0_i32_0 = arith.constant 0 : i32
    %c0_i32_1 = arith.constant 0 : i32
    return %c0_i32, %c0_i32_0 : i32, i32
  }
  func.func @transform_2(%arg0: i32) -> (i32, i32) {
    %c0_i32 = arith.constant 0 : i32
    %c0_i32_0 = arith.constant 0 : i32
    %c0_i32_1 = arith.constant 0 : i32
    return %c0_i32, %c0_i32_0 : i32, i32
  }
  func.func @transform_3(%arg0: i32) -> (i32, i32) {
    %c0_i32 = arith.constant 0 : i32
    %c0_i32_0 = arith.constant 0 : i32
    return %arg0, %c0_i32 : i32, i32
  }
}

</mosaic_0001>

<bundles_post_ra>
// kernel: tpu_custom_call.1
= control target key start
LH: loop header
LB: loop body
LE: loop exit
PB: predicated region body
PF: predicated region fallthrough
CT: control target
= control target key end

     0   :  { %8 = vsyncpa [#allocation3], 0  ;;  %s559_s0 = inlined_call_operand.hbm [shape: f32[8,32], index: 0, kind: input, shape index: {}]   ;;  %s560_s1 = inlined_call_operand.hbm [shape: bf16[32,256], index: 1, kind: input, shape index: {}]   ;;  %s561_s2 = inlined_call_operand.vmem [shape: f32[1,256], index: 2, kind: input, shape index: {}]   ;;  %s562_s3 = inlined_call_operand.hbm [shape: f32[8,128], index: 3, kind: output, shape index: {}]  }
   0x1   :  { %9 = vsyncpa [#allocation6], 0 }
   0x2   :  { %10 = vsyncpa [#allocation4], 0  ;;  %s445_s12 = smov [#allocation2]   ;;  %s446_s14 = smov [#allocation5]  }
   0x3   :  { %s17_s13 = sshll.u32 %s445_s12, 4  ;;  %s26_s15 = sshll.u32 %s446_s14, 4  ;;  %s18_s13 = int_to_ptr.vmem [resolvable:$true] %s17_s13  ;;  %s480_s15 = int_to_ptr.vmem [resolvable:$true] %s26_s15 }
   0x4   :  { %s373_s18 = scalar_lea.hbm %s559_s0, 128 }
   0x5   :  { %p374_p0 = scmp.ne.s32.totalorder %s559_s0, %s373_s18  ;;  %p377_p1 = scmp.lt.u32.totalorder %s373_s18, %s559_s0 }
   0x7   :  { %p379_p2 = pnand %p377_p1, %p374_p0 }
   0x9   :  { %382 = shalt.err (!%p379_p2)
}
   0xa   :  { %s383_s23 = scalar_lea.vmem %s18_s13, 128  ;;  %p388_p4 = scmp.lt.s32.totalorder %s18_s13, %s18_s13 }
   0xb   :  { %p384_p3 = scmp.ne.s32.totalorder %s18_s13, %s383_s23  ;;  %p389_p5 = scmp.lt.s32.totalorder %s383_s23, %s383_s23 }
   0xd   :  { %p390_p6 = por %p389_p5, %p388_p4 }
   0xf   :  { %p391_p7 = pnand %p390_p6, %p384_p3 }
  0x11   :  { %394 = shalt.err (!%p391_p7)
}
  0x12   :  { %20 = dma.hbm_to_vmem [thread:$0]  %s559_s0, 128, %s18_s13, [#allocation3]  }
  0x13   :  { %s395_s28 = scalar_lea.hbm %s560_s1, 512 }
  0x14   :  { %p396_p8 = scmp.ne.s32.totalorder %s560_s1, %s395_s28  ;;  %p399_p9 = scmp.lt.u32.totalorder %s395_s28, %s560_s1 }
  0x16   :  { %p401_p10 = pnand %p399_p9, %p396_p8 }
  0x18   :  { %404 = shalt.err (!%p401_p10)
}
  0x19   :  { %s405_s6 = scalar_lea.vmem %s480_s15, 512  ;;  %p410_p12 = scmp.lt.s32.totalorder %s480_s15, %s480_s15 }
  0x1a   :  { %p406_p11 = scmp.ne.s32.totalorder %s480_s15, %s405_s6  ;;  %p411_p13 = scmp.lt.s32.totalorder %s405_s6, %s405_s6 }
  0x1c   :  { %p412_p0 = por %p411_p13, %p410_p12 }
  0x1e   :  { %p413_p1 = pnand %p412_p0, %p406_p11 }
  0x20   :  { %416 = shalt.err (!%p413_p1)
}
  0x21   :  { %s447_s0 = smov 128   ;;  %s448_s7 = smov 8  }
  0x22   :  { %32 = dma.hbm_to_vmem [thread:$0]  %s560_s1, 512, %s480_s15, [#allocation6], %s447_s0, %s447_s0, %s448_s7  }
  0x23   :  { %439 = dma.done.wait [#allocation3], 128  }
  0x24   :  { %440 = vsyncadd [#allocation3], 4294967168 }
  0x25   :  { %441 = dma.done.wait [#allocation6], 512  }
  0x26   :  { %442 = vsyncadd [#allocation6], 4294966784  ;;  %v449_v0 = vmov 0   ;;  %v349_v1 = vld [vmem:[#allocation5 + $0x4] ss:$8 sps:$4 sm:$0xff]   ;;  %v42_v5 = vld [vmem:[#allocation2] sm:$0xff]  ;;  %v50_v7 = vlaneseq }
  0x27   :  { %116 = vmatprep.mubr.bf16.mxu0 %v449_v0  ;;  %v351_v2 = vld [vmem:[#allocation5] ss:$8 sps:$4 sm:$0xff]   ;;  %84 = vmatprep.subr.bf16.mxu0 %v349_v1  ;;  %v352_v3 = vld [vmem:[#allocation5 + $0x14] ss:$8 sps:$4 sm:$0xff]   ;;  %v354_v4 = vld [vmem:[#allocation5 + $0x10] ss:$8 sps:$4 sm:$0xff]   ;;  %v43_v6 = vpack.c.bf16 %v42_v5, %v42_v5 }
  0x28   :  { %85 = vmatpush1.bf16.msra.mxu0 %v351_v2  ;;  %vm80_vm0 = vcmask 261120   ;;  %v51_v8 = vshrl.u32 %v50_v7, 7  ;;  %v48_v10 = vld [vmem:[%s561_s2] sm:$0x3]  ;;  %vm127_vm1 = vcmask 294144   ;;  %s450_s11 = smov 96  }
  0x29   :  { %86 = vmatprep.subr.bf16.mxu0 %v352_v3  ;;  %vm138_vm2 = vcmask 31744   ;;  %v451_v24 = vmov 33   ;;  %v452_v25 = vmov 32   ;;  %v453_v32 = vmov 34   ;;  %s454_s2 = smov 112   ;;  %s456_s12 = smov 120  }
  0x2a   :  { %v56_v9 = vsub.s32 1, %v51_v8  ;;  %344 = vset.pattern.permute.xlu1 %v451_v24  ;;  %347 = vset.pattern.permute.xlu0 %v452_v25  ;;  %v52_v27 = vsub.s32 0, %v51_v8  ;;  %v455_v33 = vmov 35   ;;  %s457_s13 = smov 104   ;;  %vm192_vm3 = vcmask 64512   ;;  %s458_s14 = smov 32  }
  0x2b   :  { %vm250_vm4 = vcmask 7168   ;;  %vm252_vm5 = vcmask 15360   ;;  %vm254_vm6 = vcmask 23552   ;;  %s459_s15 = smov [#allocation7]   ;;  %vm304_vm8 = vcmask 72704  }
  0x2c   :  { %87 = vmatpush1.bf16.msra.mxu0 %v354_v4  ;;  %v57_v11 = vrot.slane %v48_v10, %v56_v9  ;;  %v53_v29 = vrot.slane %v48_v10, %v52_v27  ;;  %s313_s16 = sshll.u32 %s459_s15, 4  ;;  %s314_s16 = int_to_ptr.vmem [resolvable:$true] %s313_s16 }
  0x2d   :  { %s417_s17 = scalar_lea.vmem %s314_s16, 128  ;;  %p422_p3 = scmp.lt.s32.totalorder %s314_s16, %s314_s16 }
  0x2e   :  { %p418_p2 = scmp.ne.s32.totalorder %s314_s16, %s417_s17  ;;  %p423_p4 = scmp.lt.s32.totalorder %s417_s17, %s417_s17 }
  0x2f   :  { %327 = vmatmul.mubr.msk.bf16.vlgmr.msra.gmra.mrb[0].mxu0 %vm80_vm0, %v43_v6 }
  0x30   :  { %p424_p5 = por %p423_p4, %p422_p3 }
  0x32   :  { %p425_p6 = pnand %p424_p5, %p418_p2 }
 0x102   :  { %v118_v12 = vpop.f32.mrb[0].mxu0 }
 0x103   :  { %v120_v13 = vpop.f32.mrb[1].mxu0  ;;  %v119_v31 = vadd.f32 %v118_v12, %v53_v29 }
 0x104   :  { %v121_v14 = vadd.f32 %v120_v13, %v57_v11  ;;  %v122_v15 = vpop.f32.mrb[2].mxu0 }
 0x105   :  { %v123_v16 = vpop.f32.mrb[3].mxu0 }
 0x106   :  { %v128_v17 = vsel %vm127_vm1, %v121_v14, -inf  ;;  %v125_v34 = vmax.f32 %v121_v14, -20.0 }
 0x107   :  { %129 = vmax.xlane.f32.xlu0 %v128_v17 }
 0x108   :  { %v126_v35 = vmin.f32 %v125_v34, 2.0 }
 0x10a   :  { %v147_v36 = vsub.f32 0.0, %v126_v35 }
 0x10c   :  { %v148_v37 = vmul.f32 1.442695, %v147_v36 }
 0x194   :  { %v130_v18 = vpop.xlane.xlu0 %129 }
 0x195   :  { %v515_v19 = vsub.f32 %v121_v14, %v130_v18 }
 0x197   :  { %v132_v20 = vmul.f32 1.442695, %v515_v19 }
 0x199   :  { %355 = vpow2.f32 %v132_v20 }
 0x1a3   :  { %v356_v21 = vpop.eup %355 }
 0x1a4   :  { %135 = vrot.lane.b32.xlu0 %v356_v21, %s450_s11 }
 0x216   :  { %v136_v22 = vpop.permute.xlu0 %135 }
 0x217   :  { %v139_v23 = vsel %vm138_vm2, %v136_v22, 0.0 }
 0x218   :  { %140 = vadd.xlane.f32.xlu1 %v139_v23 }
 0x2a5   :  { %v520_v26 = vpop.xlane.xlu1 %140 }
 0x2a6   :  { %357 = vrcp.f32 %v520_v26 }
 0x2a7   :  { %359 = vpow2.f32 %v148_v37 }
 0x2b0   :  { %v358_v28 = vpop.eup %357 }
 0x2b1   :  { %v146_v30 = vmul.f32 %v358_v28, %v356_v21  ;;  %v360_v43 = vpop.eup %359 }
 0x2b3   :  { %152 = vperm.xlu0 %347, %v146_v30   ;;  %158 = vperm.xlu1 %344, %v146_v30  }
 0x2b7   :  { %345 = vset.pattern.permute.xlu1 %v453_v32  ;;  %216 = vrot.lane.b32.xlu0 %v119_v31, %s454_s2 }
 0x2b8   :  { %168 = vperm.xlu1 %345, %v146_v30   ;;  %348 = vset.pattern.permute.xlu0 %v455_v33 }
 0x2bc   :  { %346 = vset.pattern.permute.xlu1 %v455_v33 }
 0x2bd   :  { %178 = vperm.xlu1 %346, %v146_v30  }
 0x2c1   :  { %197 = vrot.lane.b32.xlu1 %v119_v31, %s456_s12 }
 0x332   :  { %v159_v38 = vpop.permute.xlu1 %158  ;;  %v153_v46 = vpop.permute.xlu0 %152 }
 0x333   :  { %v161_v39 = vmul.f32 %v159_v38, %v119_v31  ;;  %v155_v48 = vmul.f32 %v153_v46, %v119_v31 }
 0x335   :  { %163 = vrot.lane.b32.xlu1 %v161_v39, %s456_s12 }
 0x336   :  { %v217_v50 = vpop.permute.xlu0 %216 }
 0x337   :  { %v169_v40 = vpop.permute.xlu1 %168 }
 0x338   :  { %v171_v41 = vmul.f32 %v169_v40, %v119_v31 }
 0x33a   :  { %173 = vrot.lane.b32.xlu1 %v171_v41, %s454_s2 }
 0x33c   :  { %v179_v42 = vpop.permute.xlu1 %178 }
 0x33d   :  { %v181_v44 = vmul.f32 %v179_v42, %v119_v31 }
 0x33e   :  { %202 = vrot.lane.b32.xlu1 %v360_v43, %s456_s12 }
 0x33f   :  { %183 = vrot.lane.b32.xlu0 %v181_v44, %s457_s13 }
 0x340   :  { %v198_v45 = vpop.permute.xlu1 %197 }
 0x342   :  { %220 = vrot.lane.b32.xlu1 %v360_v43, %s454_s2 }
 0x343   :  { %233 = vrot.lane.b32.xlu0 %v119_v31, %s457_s13 }
 0x346   :  { %209 = vrot.lane.b32.xlu1 %v126_v35, %s456_s12 }
 0x347   :  { %237 = vrot.lane.b32.xlu0 %v360_v43, %s457_s13 }
 0x34a   :  { %243 = vrot.lane.b32.xlu1 %v126_v35, %s457_s13 }
 0x34b   :  { %226 = vrot.lane.b32.xlu0 %v126_v35, %s454_s2 }
 0x3a7   :  { %v164_v47 = vpop.permute.xlu1 %163 }
 0x3a8   :  { %v166_v51 = vadd.f32 %v164_v47, %v155_v48 }
 0x3ac   :  { %v174_v49 = vpop.permute.xlu1 %173 }
 0x3ad   :  { %v176_v52 = vadd.f32 %v174_v49, %v166_v51 }
 0x3b0   :  { %v203_v53 = vpop.permute.xlu1 %202 }
 0x3b1   :  { %v184_v54 = vpop.permute.xlu0 %183 }
 0x3b2   :  { %v527_v55 = vadd.f32 %v184_v54, %v176_v52 }
 0x3b4   :  { %v221_v56 = vpop.permute.xlu1 %220  ;;  %v219_v57 = vsub.f32 %v527_v55, %v217_v50  ;;  %v200_v58 = vsub.f32 %v527_v55, %v198_v45  ;;  %v187_v59 = vsub.f32 %v527_v55, %v119_v31  ;;  %v278_v23 = vmul.f32 -2.0, %v527_v55 }
 0x3b5   :  { %v234_v60 = vpop.permute.xlu0 %233  ;;  %v294_v47 = vsub.f32 0.6931472, %v527_v55 }
 0x3b6   :  { %v223_v61 = vmul.f32 %v221_v56, %v219_v57  ;;  %v205_v62 = vmul.f32 %v203_v53, %v200_v58  ;;  %v188_v63 = vmul.f32 %v360_v43, %v187_v59  ;;  %v236_v1 = vsub.f32 %v527_v55, %v234_v60 }
 0x3b7   :  { %v280_v24 = vand.u32 2147483647, %v278_v23  ;;  %v279_v45 = vmax.f32 %v278_v23, 0.0 }
 0x3b8   :  { %v224_v0 = vmul.f32 -0.5, %v223_v61  ;;  %v206_v2 = vmul.f32 -0.5, %v205_v62  ;;  %v189_v3 = vmul.f32 -0.5, %v188_v63  ;;  %v210_v8 = vpop.permute.xlu1 %209 }
 0x3b9   :  { %v238_v4 = vpop.permute.xlu0 %237  ;;  %v281_v25 = vsub.f32 0.0, %v280_v24 }
 0x3ba   :  { %v207_v5 = vmul.f32 %v206_v2, %v205_v62  ;;  %v240_v6 = vmul.f32 %v238_v4, %v236_v1  ;;  %v190_v7 = vmul.f32 %v189_v3, %v188_v63  ;;  %v225_v11 = vmul.f32 %v224_v0, %v223_v61 }
 0x3bb   :  { %v282_v27 = vmul.f32 1.442695, %v281_v25 }
 0x3bc   :  { %v212_v9 = vsub.f32 %v207_v5, %v210_v8  ;;  %v241_v10 = vmul.f32 -0.5, %v240_v6  ;;  %v191_v12 = vsub.f32 %v190_v7, %v126_v35  ;;  %v244_v18 = vpop.permute.xlu1 %243 }
 0x3bd   :  { %v227_v13 = vpop.permute.xlu0 %226  ;;  %361 = vpow2.f32 %v282_v27 }
 0x3be   :  { %v242_v14 = vmul.f32 %v241_v10, %v240_v6  ;;  %v229_v15 = vsub.f32 %v225_v11, %v227_v13  ;;  %v213_v16 = vsel %vm192_vm3, %v212_v9, 0.0  ;;  %v193_v17 = vsel %vm192_vm3, %v191_v12, 0.0 }
 0x3bf   :  { %214 = vadd.xlane.f32.xlu1 %v213_v16  ;;  %194 = vadd.xlane.f32.xlu0 %v193_v17 }
 0x3c0   :  { %v246_v20 = vsub.f32 %v242_v14, %v244_v18  ;;  %v230_v21 = vsel %vm192_vm3, %v229_v15, 0.0 }
 0x3c2   :  { %v247_v22 = vsel %vm192_vm3, %v246_v20, 0.0 }
 0x3c3   :  { %231 = vadd.xlane.f32.xlu0 %v230_v21 }
 0x3c7   :  { %248 = vadd.xlane.f32.xlu0 %v247_v22  ;;  %v362_v29 = vpop.eup %361 }
 0x3c8   :  { %v284_v32 = vadd.f32 1.0, %v362_v29  ;;  %v287_v38 = vmul.f32 -0.5, %v362_v29  ;;  %v290_v41 = vand.u32 2147483647, %v362_v29 }
 0x3ca   :  { %363 = vlog2.f32 %v284_v32  ;;  %v288_v40 = vadd.f32 1.0, %v287_v38  ;;  %vm291_vm7 = vcmp.lt.f32.partialorder %v290_v41, 0.0004427343 }
 0x3cb   :  { %365 = vlog2.f32 %v520_v26 }
 0x3cc   :  { %v289_v43 = vmul.f32 %v362_v29, %v288_v40 }
 0x3d4   :  { %v364_v39 = vpop.eup %363 }
 0x3d5   :  { %v286_v42 = vmul.f32 0.6931472, %v364_v39  ;;  %v366_v51 = vpop.eup %365 }
 0x3d6   :  { %v143_v52 = vmul.f32 0.6931472, %v366_v51 }
 0x3d7   :  { %v292_v44 = vsel %vm291_vm7, %v289_v43, %v286_v42 }
 0x3d8   :  { %v293_v46 = vadd.f32 %v292_v44, %v279_v45  ;;  %v144_v53 = vsub.f32 %v515_v19, %v143_v52 }
 0x3da   :  { %v295_v48 = vsub.f32 %v294_v47, %v293_v46 }
 0x3dc   :  { %v296_v49 = vmul.f32 2.0, %v295_v48 }
 0x3de   :  { %v297_v50 = vsel %vm192_vm3, %v296_v49, 0.0 }
 0x44c   :  { %v195_v28 = vpop.xlane.xlu0 %194  ;;  %v215_v30 = vpop.xlane.xlu1 %214 }
 0x44d   :  { %v251_v33 = vsel %vm250_vm4, %v195_v28, %v215_v30 }
 0x450   :  { %v232_v31 = vpop.xlane.xlu0 %231 }
 0x451   :  { %v253_v34 = vsel %vm252_vm5, %v251_v33, %v232_v31 }
 0x454   :  { %v249_v35 = vpop.xlane.xlu0 %248 }
 0x455   :  { %v255_v36 = vsel %vm254_vm6, %v253_v34, %v249_v35 }
 0x456   :  { %v328_v37 = vadd.f32 -7.351508, %v255_v36 }
 0x458   :  { %258 = vrot.lane.b32.xlu0 %v328_v37, %s458_s14 }
 0x477   :  { %298 = vadd.xlane.f32.xlu0 %v297_v50 }
 0x4ca   :  { %v259_v54 = vpop.permute.xlu0 %258 }
 0x4cb   :  { %v261_v56 = vadd.f32 %v259_v54, %v144_v53 }
 0x4cd   :  { %v262_v57 = vsel %vm127_vm1, %v261_v56, -inf }
 0x4ce   :  { %263 = vmax.xlane.f32.xlu1 %v262_v57 }
 0x504   :  { %v299_v3 = vpop.xlane.xlu0 %298 }
 0x55b   :  { %v264_v58 = vpop.xlane.xlu1 %263 }
 0x55c   :  { %v265_v59 = vsub.f32 %v261_v56, %v264_v58 }
 0x55e   :  { %v266_v60 = vmul.f32 1.442695, %v265_v59 }
 0x560   :  { %367 = vpow2.f32 %v266_v60 }
 0x56a   :  { %v368_v61 = vpop.eup %367 }
 0x56b   :  { %269 = vrot.lane.b32.xlu1 %v368_v61, %s450_s11 }
 0x5dd   :  { %v270_v62 = vpop.permute.xlu1 %269 }
 0x5de   :  { %v272_v63 = vsel %vm138_vm2, %v270_v62, 0.0 }
 0x5df   :  { %273 = vadd.xlane.f32.xlu1 %v272_v63 }
 0x66c   :  { %v274_v26 = vpop.xlane.xlu1 %273 }
 0x66d   :  { %369 = vlog2.f32 %v274_v26 }
 0x66e   :  { %371 = vtanh.f32 %v527_v55 }
 0x677   :  { %v370_v19 = vpop.eup %369 }
 0x678   :  { %v276_v0 = vmul.f32 0.6931472, %v370_v19  ;;  %v372_v1 = vpop.eup %371 }
 0x679   :  { %v302_v5 = vmul.f32 1.5, %v372_v1 }
 0x67a   :  { %v277_v2 = vadd.f32 %v276_v0, %v264_v58 }
 0x67c   :  { %v300_v4 = vsub.f32 %v277_v2, %v299_v3 }
 0x67e   :  { %v303_v6 = vsel %vm192_vm3, %v302_v5, %v300_v4 }
 0x67f   :  { %v305_v7 = vsel %vm304_vm8, %v303_v6, 0.0 }
 0x680   :  { %306 = vst [vmem:[#allocation7] sm:$0xff] %v305_v7 }
 0x681   :  { %428 = shalt.err (!%p425_p6)
}
 0x682   :  { %s429_s20 = scalar_lea.hbm %s562_s3, 128 }
 0x683   :  { %p430_p7 = scmp.ne.s32.totalorder %s562_s3, %s429_s20  ;;  %p433_p8 = scmp.lt.u32.totalorder %s429_s20, %s562_s3 }
 0x685   :  { %p435_p9 = pnand %p433_p8, %p430_p7 }
 0x687   :  { %438 = shalt.err (!%p435_p9)
}
 0x688   :  { %316 = dma.vmem_to_hbm [thread:$0]  %s314_s16, 128, %s562_s3, [#allocation4]  }
 0x689   :  { %443 = dma.done.wait [#allocation4], 128  }
 0x68a   :  { %444 = vsyncadd [#allocation4], 4294967168 }
 0x68b   :  { %320 = vsyncpa [#allocation3], 1 }
 0x68c   :  { %321 = vsyncpa [#allocation6], 1 }
 0x68d   :  { %322 = vsyncpa [#allocation4], 1 }

</bundles_post_ra>
